<compile_context>
chip_gen: v5e
topology: v5e:2x2
jax: 0.10.0
libtpu: 0.0.40
codegen_flags: <defaults>
</compile_context>

<pallas_src>
import jax
import jax.numpy as jnp
from jax import lax
from jax.experimental import pallas as pl
from jax.experimental.pallas import tpu as pltpu

# Small shapes consistent with the module (hidden_channel -> vocab, 128 -> emb
# dim, class_num, batch_size).  Production (vocab=2048, class_num 1000->1024,
# batch=256) uses the identical single-step-per-N-half structure.
BATCH = 8
VOCAB = 128         # hidden_channel (=2048 in the original test); lane-dense
EMB_DIM = 128       # embedding dim (same as original)
CLASS_NUM = 256     # class_num (=1000 in the original test; lane-dense multiple of 128)
NUM_IDX = BATCH     # x is a 1-D LongTensor of length batch_size in the test
TN = CLASS_NUM // 2 # per-core output half (v7x megacore); 128 -> lane-dense


def _fused_kernel(idx_ref,            # VMEM int32  (NUM_IDX, 1)
                  emb_ref,            # VMEM bf16   (VOCAB, EMB_DIM)
                  w_ref,              # VMEM bf16   (EMB_DIM, TN)   == torch weight.T slice
                  b_ref,              # VMEM f32    (1, TN)
                  out_ref):           # VMEM f32    (BATCH, TN)
    num_idx = idx_ref.shape[0]
    vocab = emb_ref.shape[0]

    # --- EmbeddingBag(mode='sum') with offsets == arange(batch) ----------------
    # One index per bag -> the gathered rows ARE the bag sums (segment-sum elided).
    # One-hot gather via MXU: gather_oh[j, v] = (indices[j] == v).
    # Compare in int32 (VPU has no bf16 path on v5e); cast to bf16 only at the
    # MXU input.  Out-of-range index -> all-zero row.
    iota_v = lax.broadcasted_iota(jnp.int32, (num_idx, vocab), 1)
    gather_oh = (idx_ref[...] == iota_v).astype(jnp.bfloat16)          # (B, V) bf16
    bags_f32 = jnp.dot(gather_oh, emb_ref[...],
                       preferred_element_type=jnp.float32)             # (B, D) f32
    # One-hot -> bags_f32 entries are exactly bf16 table values; cast is lossless.
    bags = bags_f32.astype(jnp.bfloat16)

    # --- Linear: (B, D) @ (D, TN) + bias ---------------------------------------
    out_ref[...] = jnp.dot(bags, w_ref[...],
                           preferred_element_type=jnp.float32) + b_ref[...]


def training_sparse_model(indices, emb_table, fc_w, fc_b):
    """indices: (num_idx,) int; emb_table: (V, D); fc_w: (D, N) (= torch weight.T);
    fc_b: (1, N).  Returns (BATCH, N) f32, matching EmbeddingBag(sum)+Linear with
    offsets = arange(batch)."""
    idx_col = indices.reshape(-1, 1).astype(jnp.int32)       # (NUM_IDX, 1)
    emb_bf16 = emb_table.astype(jnp.bfloat16)                 # halve HBM bytes, single-pass MXU
    w_bf16 = fc_w.astype(jnp.bfloat16)
    b_f32 = fc_b.astype(jnp.float32)

    cost = pl.CostEstimate(
        flops=2 * (NUM_IDX * VOCAB * EMB_DIM + BATCH * EMB_DIM * CLASS_NUM),
        transcendentals=0,
        bytes_accessed=(VOCAB * EMB_DIM * 2 + EMB_DIM * CLASS_NUM * 2
                        + CLASS_NUM * 4 + NUM_IDX * 4 + BATCH * CLASS_NUM * 4),
    )

    return pl.pallas_call(
        _fused_kernel,
        out_shape=jax.ShapeDtypeStruct((BATCH, CLASS_NUM), jnp.float32),
        grid=(CLASS_NUM // TN,),  # 2-way split over N: both TCs on v7x, ~free elsewhere
        in_specs=[
            pl.BlockSpec((NUM_IDX, 1), lambda j: (0, 0)),      # indices (full)
            pl.BlockSpec((VOCAB, EMB_DIM), lambda j: (0, 0)),  # table   (full)
            pl.BlockSpec((EMB_DIM, TN), lambda j: (0, j)),     # fc_w N-half
            pl.BlockSpec((1, TN), lambda j: (0, j)),           # fc_b N-half
        ],
        out_specs=pl.BlockSpec((BATCH, TN), lambda j: (0, j)), # lane-dense (TN=128)
        compiler_params=pltpu.CompilerParams(
            dimension_semantics=("parallel",)),
        cost_estimate=cost,
    )(idx_col, emb_bf16, w_bf16, b_f32)


def reference(indices, emb_table, fc_w, fc_b):
    # Same bf16 operand rounding as the kernel, f32 accumulation.
    emb_bf = emb_table.astype(jnp.bfloat16).astype(jnp.float32)
    w_bf = fc_w.astype(jnp.bfloat16).astype(jnp.float32)
    bags = emb_bf[indices]                                   # one index per bag
    return bags @ w_bf + fc_b


if __name__ == "__main__":
    key = jax.random.PRNGKey(0)
    k_emb, k_w, k_b, k_idx = jax.random.split(key, 4)

    # Deterministic synthetic parameters matching the module's layer shapes.
    emb_table = jax.random.normal(k_emb, (VOCAB, EMB_DIM), jnp.float32) * 0.05
    fc_w = jax.random.normal(k_w, (EMB_DIM, CLASS_NUM), jnp.float32) * 0.05   # torch weight.T
    fc_b = jax.random.normal(k_b, (1, CLASS_NUM), jnp.float32) * 0.05

    # Input: 1-D LongTensor of length batch_size; offsets = arange(batch_size)
    # => bag j owns exactly indices[j].
    indices = jax.random.randint(k_idx, (NUM_IDX,), 0, VOCAB, jnp.int32)

    out = training_sparse_model(indices, emb_table, fc_w, fc_b)
    out = jax.block_until_ready(out)

    ref = reference(indices, emb_table, fc_w, fc_b)
    assert out.shape == (BATCH, CLASS_NUM)
    assert jnp.allclose(out, ref, atol=1e-3, rtol=1e-3), "mismatch vs reference"

    print("KERNEL_OK")
</pallas_src>

<mosaic_0001>
module attributes {stable_mosaic.version = 11 : i64} {
  func.func @_fused_kernel(%arg0: i32, %arg1: memref<8x1xi32, #tpu.memory_space<vmem>>, %arg2: memref<128x128xbf16, #tpu.memory_space<vmem>>, %arg3: memref<128x128xbf16, #tpu.memory_space<vmem>>, %arg4: memref<1x128xf32, #tpu.memory_space<vmem>>, %arg5: memref<8x128xf32, #tpu.memory_space<vmem>>) attributes {dimension_semantics = [#tpu.dimension_semantics<parallel>], iteration_bounds = array<i64: 2>, scalar_prefetch = 0 : i64, scratch_operands = 0 : i64, tpu.core_type = #tpu.core_type<tc>, window_params = [{pipeline_mode = #tpu.pipeline_mode<synchronous>, transform_indices = @transform_0, window_bounds = array<i64: 8, 1>}, {pipeline_mode = #tpu.pipeline_mode<synchronous>, transform_indices = @transform_1, window_bounds = array<i64: 128, 128>}, {transform_indices = @transform_2, window_bounds = array<i64: 128, 128>}, {transform_indices = @transform_3, window_bounds = array<i64: 1, 128>}, {transform_indices = @transform_4, window_bounds = array<i64: 8, 128>}]} {
    %0 = tpu.iota {dimensions = array<i32: 1>} : vector<8x128xi32>
    %c0 = arith.constant 0 : index
    %c0_0 = arith.constant 0 : index
    %1 = vector.load %arg1[%c0, %c0_0] : memref<8x1xi32, #tpu.memory_space<vmem>>, vector<8x1xi32>
    %2 = vector.broadcast %1 : vector<8x1xi32> to vector<8x128xi32>
    %3 = arith.cmpi eq, %2, %0 : vector<8x128xi32>
    %4 = arith.extui %3 : vector<8x128xi1> to vector<8x128xi32>
    %5 = arith.sitofp %4 : vector<8x128xi32> to vector<8x128xf32>
    %6 = arith.truncf %5 : vector<8x128xf32> to vector<8x128xbf16>
    %c0_1 = arith.constant 0 : index
    %c0_2 = arith.constant 0 : index
    %7 = vector.load %arg2[%c0_1, %c0_2] : memref<128x128xbf16, #tpu.memory_space<vmem>>, vector<128x128xbf16>
    %cst = arith.constant dense<0.000000e+00> : vector<8x128xf32>
    %8 = tpu.matmul %6, %7, %cst {dimension_numbers = #tpu.dot_dimension_numbers<[1], [0], [0], [1], [0, 0, 1, 1], [], []>} : vector<8x128xbf16>, vector<128x128xbf16>, vector<8x128xf32> -> vector<8x128xf32>
    %9 = arith.truncf %8 : vector<8x128xf32> to vector<8x128xbf16>
    %c0_3 = arith.constant 0 : index
    %c0_4 = arith.constant 0 : index
    %10 = vector.load %arg3[%c0_3, %c0_4] : memref<128x128xbf16, #tpu.memory_space<vmem>>, vector<128x128xbf16>
    %cst_5 = arith.constant dense<0.000000e+00> : vector<8x128xf32>
    %11 = tpu.matmul %9, %10, %cst_5 {dimension_numbers = #tpu.dot_dimension_numbers<[1], [0], [0], [1], [0, 0, 1, 1], [], []>} : vector<8x128xbf16>, vector<128x128xbf16>, vector<8x128xf32> -> vector<8x128xf32>
    %c0_6 = arith.constant 0 : index
    %c0_7 = arith.constant 0 : index
    %12 = vector.load %arg4[%c0_6, %c0_7] : memref<1x128xf32, #tpu.memory_space<vmem>>, vector<1x128xf32>
    %13 = vector.broadcast %12 : vector<1x128xf32> to vector<8x128xf32>
    %14 = arith.addf %11, %13 : vector<8x128xf32>
    %c0_8 = arith.constant 0 : index
    %c0_9 = arith.constant 0 : index
    %15 = vector.load %arg5[%c0_8, %c0_9] : memref<8x128xf32, #tpu.memory_space<vmem>>, vector<8x128xf32>
    tpu.vector_store %arg5[%c0_8, %c0_9], %14 {strides = array<i32>} : memref<8x128xf32, #tpu.memory_space<vmem>>, vector<8x128xf32>,
    return
  }
  func.func @transform_0(%arg0: i32) -> (i32, i32) {
    %c0_i32 = arith.constant 0 : i32
    %c0_i32_0 = arith.constant 0 : i32
    %c0_i32_1 = arith.constant 0 : i32
    return %c0_i32, %c0_i32_0 : i32, i32
  }
  func.func @transform_1(%arg0: i32) -> (i32, i32) {
    %c0_i32 = arith.constant 0 : i32
    %c0_i32_0 = arith.constant 0 : i32
    %c0_i32_1 = arith.constant 0 : i32
    return %c0_i32, %c0_i32_0 : i32, i32
  }
  func.func @transform_2(%arg0: i32) -> (i32, i32) {
    %c0_i32 = arith.constant 0 : i32
    %c0_i32_0 = arith.constant 0 : i32
    return %c0_i32, %arg0 : i32, i32
  }
  func.func @transform_3(%arg0: i32) -> (i32, i32) {
    %c0_i32 = arith.constant 0 : i32
    %c0_i32_0 = arith.constant 0 : i32
    return %c0_i32, %arg0 : i32, i32
  }
  func.func @transform_4(%arg0: i32) -> (i32, i32) {
    %c0_i32 = arith.constant 0 : i32
    %c0_i32_0 = arith.constant 0 : i32
    return %c0_i32, %arg0 : i32, i32
  }
}

</mosaic_0001>

<bundles_post_ra>
// kernel: tpu_custom_call.1
= control target key start
LH: loop header
LB: loop body
LE: loop exit
PB: predicated region body
PF: predicated region fallthrough
CT: control target
= control target key end

     0   :  { %9 = vsyncpa [#allocation3], 0  ;;  %s1013_s0 = inlined_call_operand.vmem [shape: s32[8,1], index: 0, kind: input, shape index: {}]   ;;  %s1014_s1 = inlined_call_operand.hbm [shape: bf16[128,128], index: 1, kind: input, shape index: {}]   ;;  %s1015_s2 = inlined_call_operand.hbm [shape: bf16[128,256], index: 2, kind: input, shape index: {}]   ;;  %s1016_s3 = inlined_call_operand.vmem [shape: f32[1,256], index: 3, kind: input, shape index: {}]   ;;  %s1017_s4 = inlined_call_operand.hbm [shape: f32[8,256], index: 4, kind: output, shape index: {}]  }
   0x1   :  { %10 = vsyncpa [#allocation6], 0 }
   0x2   :  { %12 = vsyncpa [#allocation6 + $0x1], 0 }
   0x3   :  { %13 = vsyncpa [#allocation4], 0 }
   0x4   :  { %15 = vsyncpa [#allocation4 + $0x1], 0  ;;  %s849_s15 = smov 0   ;;  %s851_s16 = smov 0  }
   0x5   :  { %s853_s17 = smov 0   ;;  %s855_s18 = smov 0  }
   0x6 LB: > { %s870_s19 = sadd.s32 4294967295, %s816_s18   ;;  %s525_s20 = sadd.s32 4294967294, %s816_s18   ;;  %s816_s18 = sphi %s855_s18, %s1027_s18   ;;  %s812_s17 = sphi %s853_s17, %s1026_s17   ;;  %s808_s16 = sphi %s851_s16, %s1025_s16   ;;  %s804_s15 = sphi %s849_s15, %s1024_s15  }
   0x7   : > { %p83_p0 = scmp.ne.s32.totalorder %s808_s16, %s804_s15  ;;  %p84_p1 = scmp.eq.s32.totalorder %s870_s19, 0 }
   0x8   : > { %p133_p2 = scmp.eq.s32.totalorder %s870_s19, 1  ;;  %p139_p3 = scmp.eq.s32.totalorder %s525_s20, 1 }
   0x9   : > { %p879_p4 = por %p84_p1, %p83_p0  ;;  %p526_p5 = scmp.ge.s32.totalorder %s816_s18, 1 }
   0xa   : > { %p884_p6 = por %p139_p3, %p83_p0  ;;  %p146_p7 = scmp.lt.s32.totalorder %s816_s18, 3 }
   0xb   : > { %s160_s25 = sshll.u32 %s1014_s1, 4  ;;  %s818_s27 = smov [#allocation2]   ;;  %s161_s25 = int_to_ptr.hbm [resolvable:$true] %s160_s25 }
   0xc   : > { %p892_p8 = pnand %p526_p5, %p146_p7  ;;  %s162_s28 = sshll.u32 %s818_s27, 4  ;;  %s163_s28 = int_to_ptr.vmem [resolvable:$true] %s162_s28 }
   0xd   : > { %s902_s29 = sadd.s32 1, %s816_s18   ;;  %s819_s30 = smov 64  }
   0xe   : > { %p630_p9 = pneg %p892_p8  ;;  %s820_s5 = smov 4  }
   0xf   : > { %s67_s6 = ssub.s32 %s816_s18, %s902_s29  ;;  %s70_s7 = sadd.s32 1, %s812_s17 }
  0x10   : > { %p631_p10 = pnand %p630_p9, %p84_p1  ;;  %p68_p12 = scmp.eq.s32.totalorder %s67_s6, 0 }
  0x11   : > { %p77_p13 = scmp.ne.s32.totalorder %s812_s17, %s808_s16  ;;  %p78_p0 = scmp.eq.s32.totalorder %s816_s18, 0 }
  0x12   : > { %633 = dma.hbm_to_vmem [thread:$0]  (!%p631_p10), %s161_s25, 1024, %s163_s28, [#allocation3], %s819_s30, %s819_s30, %s820_s5  }
  0x13   : > { %p643_p3 = scmp.lt.s32.totalorder %s816_s18, 2  ;;  %p79_p5 = por %p78_p0, %p77_p13 }
  0x14   : > { %s915_s8 = scalar_select %p68_p12, %s812_s17, %s70_s7  }
  0x15   : > { %p919_p7 = por %p133_p2, %p77_p13  ;;  %s176_s10 = sand.u32 1, %s812_s17  }
  0x16   : > { %s530_s11 = sshll.u32 %s816_s18, 2  ;;  %s529_s12 = sshll.u32 %s176_s10, 6 }
  0x17   : > { %s184_s20 = scalar_lea.hbm %s1015_s2, %s530_s11  ;;  %s180_s24 = scalar_lea.vmem [#allocation5], %s529_s12 }
  0x18   : > { %s185_s23 = sshll.u32 %s184_s20, 4  ;;  %s187_s25 = sshll.u32 %s180_s24, 4  ;;  %s186_s23 = int_to_ptr.hbm [resolvable:$true] %s185_s23  ;;  %s188_s25 = int_to_ptr.vmem [resolvable:$true] %s187_s25 }
  0x19   : > { %p930_p9 = pnand %p643_p3, %p79_p5  ;;  %s177_s28 = scalar_lea.sflag [#allocation6], %s176_s10 }
  0x1a   : > { %s716_s6 = sshra.s32 %s186_s23, 4  ;;  %s723_s13 = scalar_lea.hbm %s1015_s2, 128  ;;  %s717_s6 = int_to_ptr.hbm [resolvable:$true] %s716_s6 }
  0x1b   : > { %s718_s7 = scalar_lea.hbm %s717_s6, 64  ;;  %p720_p10 = pneg %p930_p9 }
  0x1c   : > { %p719_p2 = scmp.ne.s32.totalorder %s717_s6, %s718_s7  ;;  %p724_p0 = scmp.lt.s32.totalorder %s717_s6, %s1015_s2 }
  0x1d   : > { %p725_p3 = scmp.lt.s32.totalorder %s723_s13, %s718_s7 }
  0x1e   : > { %p721_p12 = pnand %p720_p10, %p719_p2 }
  0x1f   : > { %p726_p5 = por %p725_p3, %p724_p0 }
  0x20   : > { %p722_p13 = pneg %p721_p12 }
  0x22   : > { %p727_p11 = pnand %p726_p5, %p722_p13 }
  0x24   : > { %730 = shalt.err (!%p727_p11)
}
  0x25   : > { %s821_s10 = smov 128   ;;  %205 = sbr.rel (%p892_p8) target bundleno = 428 (0x1ac), region = 36 }
  0x26   : > { %637 = dma.hbm_to_vmem [thread:$0]  (!%p930_p9), %s186_s23, 1024, %s188_s25, %s177_s28, %s821_s10, %s819_s30, %s820_s5  }
  0x2a   : > { %791 = dma.done.wait (%p84_p1), [#allocation3], 1024  }
  0x2b   : > { %793 = vsyncadd (%p84_p1), [#allocation3], 4294966272  ;;  %s953_s24 = sand.u32 1, %s808_s16  }
  0x2c   : > { %s533_s6 = sshll.u32 %s953_s24, 6  ;;  %s213_s27 = scalar_lea.sflag [#allocation6], %s953_s24 }
  0x2d   : > { %s957_s7 = scalar_lea.vmem [#allocation5], %s533_s6 }
  0x2e   : > { %795 = dma.done.wait (%p879_p4), %s213_s27, 1024  }
  0x2f   : > { %797 = vsyncadd (%p879_p4), %s213_s27, 4294966272  ;;  %v822_v0 = vmov 0   ;;  %v250_v1 = vld [vmem:[%s1013_s0] sm:$0xff]  ;;  %v613_v2 = vld [vmem:[#allocation2 + $0x38] sm:$0xff]  ;;  %v248_v16 = vlaneseq  ;;  %v823_v20 = vmov 1.0|1.0  }
  0x30   : > { %684 = vset.pattern.permute.xlu0 %v822_v0  ;;  %322 = vmatpush.bf16.msra.mxu0 %v613_v2  ;;  %v612_v3 = vld [vmem:[#allocation2 + $0x30] sm:$0xff]  ;;  %v611_v4 = vld [vmem:[#allocation2 + $0x28] sm:$0xff]  ;;  %v610_v5 = vld [vmem:[#allocation2 + $0x20] sm:$0xff]  ;;  %p245_p1 = scmp.lt.s32.totalorder %s870_s19, 1  ;;  %s603_s28 = sshll.u32 %s870_s19, 3 }
  0x31   : > { %252 = vperm.xlu0 %684, %v250_v1   ;;  %v609_v6 = vld [vmem:[#allocation2 + $0x18] sm:$0xff]  ;;  %v608_v7 = vld [vmem:[#allocation2 + $0x10] sm:$0xff]  ;;  %v607_v8 = vld [vmem:[#allocation2 + $0x8] sm:$0xff]  ;;  %v249_v18 = vand.u32 127, %v248_v16  ;;  %s534_s11 = sshll.u32 %s953_s24, 3  ;;  %s429_s14 = scalar_lea.hbm %s1017_s4, %s603_s28 }
  0x32   : > { %v606_v9 = vld [vmem:[#allocation2] sm:$0xff]  ;;  %v621_v10 = vld [vmem:[%s957_s7 + $0x38] sm:$0xff]  ;;  %v620_v11 = vld [vmem:[%s957_s7 + $0x30] sm:$0xff]  ;;  %s246_s21 = scalar_select %p245_p1, %s870_s19, 1 }
  0x33   : > { %404 = vmatpush.bf16.msra.mxu1 %v621_v10  ;;  %v619_v12 = vld [vmem:[%s957_s7 + $0x28] sm:$0xff]  ;;  %v618_v13 = vld [vmem:[%s957_s7 + $0x20] sm:$0xff]  ;;  %v617_v14 = vld [vmem:[%s957_s7 + $0x18] sm:$0xff]  ;;  %s244_s20 = scalar_lea.vmem [#allocation7], %s534_s11  ;;  %s433_s6 = sshll.u32 %s429_s14, 4  ;;  %s434_s6 = int_to_ptr.hbm [resolvable:$true] %s433_s6 }
  0x34   : > { %323 = vmatpush.bf16.msra.mxu0 %v612_v3  ;;  %v616_v15 = vld [vmem:[%s957_s7 + $0x10] sm:$0xff]  ;;  %v615_v17 = vld [vmem:[%s957_s7 + $0x8] sm:$0xff]  ;;  %s247_s25 = scalar_lea.vmem %s1016_s3, %s246_s21  ;;  %v614_v21 = vld [vmem:[%s957_s7] sm:$0xff]  ;;  %s431_s10 = sshll.u32 %s244_s20, 4  ;;  %s432_s10 = int_to_ptr.vmem [resolvable:$true] %s431_s10 }
  0x35   : > { %v685_v25 = vld [vmem:[%s247_s25] ss:$0 sm:$0xff]  ;;  %s419_s27 = scalar_lea.sflag [#allocation4], %s953_s24  ;;  %s760_s7 = sshra.s32 %s434_s6, 4  ;;  %s761_s7 = int_to_ptr.hbm [resolvable:$true] %s760_s7 }
  0x36   : > { %s762_s26 = scalar_lea.hbm %s761_s7, 8  ;;  %s766_s21 = scalar_lea.hbm %s1017_s4, 16 }
  0x37   : > { %405 = vmatpush.bf16.msra.mxu1 %v620_v11  ;;  %p763_p4 = scmp.ne.s32.totalorder %s761_s7, %s762_s26  ;;  %p767_p9 = scmp.lt.s32.totalorder %s761_s7, %s1017_s4 }
  0x38   : > { %324 = vmatpush.bf16.msra.mxu0 %v611_v4  ;;  %p768_p2 = scmp.lt.s32.totalorder %s766_s21, %s762_s26 }
  0x39   : > { %p764_p8 = pnand %p763_p4, %p919_p7 }
  0x3a   : > { %p769_p10 = por %p768_p2, %p767_p9 }
  0x3b   : > { %406 = vmatpush.bf16.msra.mxu1 %v619_v12  ;;  %p765_p11 = pneg %p764_p8 }
  0x3c   : > { %325 = vmatpush.bf16.msra.mxu0 %v610_v5 }
  0x3d   : > { %p770_p12 = pnand %p769_p10, %p765_p11 }
  0x3f   : > { %407 = vmatpush.bf16.msra.mxu1 %v618_v13 }
  0x40   : > { %326 = vmatpush.bf16.msra.mxu0 %v609_v6 }
  0x43   : > { %408 = vmatpush.bf16.msra.mxu1 %v617_v14 }
  0x44   : > { %327 = vmatpush.bf16.msra.mxu0 %v608_v7 }
  0x47   : > { %409 = vmatpush.bf16.msra.mxu1 %v616_v15 }
  0x48   : > { %328 = vmatpush.bf16.msra.mxu0 %v607_v8 }
  0x4b   : > { %410 = vmatpush.bf16.msra.mxu1 %v615_v17 }
  0x4c   : > { %329 = vmatpush.bf16.msra.mxu0 %v606_v9 }
  0x4f   : > { %411 = vmatpush.bf16.msra.mxu1 %v614_v21 }
  0xa3   : > { %v253_v19 = vpop.permute.xlu0 %252 }
  0xa4   : > { %vm254_vm0 = vcmp.eq.s32.totalorder %v253_v19, %v249_v18 }
  0xa5   : > { %vm568_vm1 = vmpackc.low %vm254_vm0, %vm254_vm0 }
  0xa6   : > { %569 = vmatmul.msk.bf16.vlgmr.msra.gmra.mxu0 %vm568_vm1, %v823_v20 }
 0x123   : > { %v331_v22 = vpop.f32.mrf.mxu0 }
 0x124   : > { %v335_v23 = vpack.c.bf16 %v331_v22, %v331_v22 }
 0x126   : > { %412 = vmatmul.bf16.vlgmr.msra.gmra.mxu1 %v335_v23 }
 0x12b   : > { %v333_v24 = vpop.f32.mrf.mxu0 }
 0x1a3   : > { %v413_v26 = vpop.f32.mrf.mxu1 }
 0x1a4   : > { %v414_v27 = vadd.f32 %v685_v25, %v413_v26 }
 0x1a6   : > { %417 = vst [vmem:[%s244_s20] sm:$0xff] %v414_v27 }
 0x1a7   : > { %773 = shalt.err (!%p770_p12)
}
 0x1a8   : > { %628 = dma.vmem_to_hbm [thread:$0]  (%p919_p7), %s432_s10, 128, %s434_s6, %s419_s27  }
 0x1ab   : > { %v415_v28 = vpop.f32.mrf.mxu1 }
 0x1ac PF: > { %s445_s24 = sand.u32 1, %s804_s15   ;;  %p1023_p13 = scmp.ge.s32.totalorder %s816_s18, 2 }
 0x1ad   : > { %s446_s25 = scalar_lea.sflag [#allocation4], %s445_s24 }
 0x1ae   : > { %p639_p0 = pnand %p1023_p13, %p884_p6 }
 0x1b0   : > { %p640_p3 = pneg %p639_p0 }
 0x1b2   : > { %799 = dma.done.wait (%p640_p3), %s446_s25, 128  }
 0x1b3   : > { %801 = vsyncadd (%p640_p3), %s446_s25, 4294967168  ;;  %p18_p5 = scmp.ge.s32.totalorder %s902_s29, 4   ;;  %s1024_s15 = smov %s808_s16 }
 0x1b4   : > { %s1025_s16 = smov %s812_s17  ;;  %s1026_s17 = smov %s915_s8 }
 0x1b5   : > { %s1027_s18 = smov %s902_s29  ;;  %20 = sbr.rel (!%p18_p5) target bundleno = 6 (0x6), region = 89 }
 0x1ba   :  { %452 = vsyncpa [#allocation3], 1 }
 0x1bb   :  { %454 = vsyncpa [#allocation3 + $0x1], 1 }
 0x1bc   :  { %455 = vsyncpa [#allocation6], 1 }
 0x1bd   :  { %457 = vsyncpa [#allocation6 + $0x1], 1 }
 0x1be   :  { %458 = vsyncpa [#allocation4], 1 }
 0x1bf   :  { %460 = vsyncpa [#allocation4 + $0x1], 1 }

</bundles_post_ra>
